<compile_context>
chip_gen: v5e
topology: v5e:2x2
jax: 0.10.0
libtpu: 0.0.40
codegen_flags: <defaults>
</compile_context>

<pallas_src>
import functools
import math

import jax
import jax.numpy as jnp
from jax.experimental import pallas as pl
from jax.experimental.pallas import tpu as pltpu


# ----------------------------- kernels ------------------------------------ #

def _project_kernel(ones_col, x_ref, w_ref, xp_ref):
    # X_prime tile = X_tile @ W_pad   (f32 MXU); stored bf16 for the big SpMM.
    xp = jnp.dot(x_ref[...], w_ref[...], preferred_element_type=jnp.float32)
    # Write 1.0 into one spare padding column: SpMM(att, ones) then falls out of the
    # same MXU matmul as the numerator in pass C (no XLU lane reduce needed there).
    col = jax.lax.broadcasted_iota(jnp.int32, xp.shape, 1)
    xp = jnp.where(col == ones_col, 1.0, xp)
    xp_ref[...] = xp.astype(xp_ref.dtype)


def _minmax_kernel(s1_ref, s0t_ref, adj_ref, min_ref, max_ref):
    # Global min/max of the RAW scores s1[i] + s0[j] over edges.  LeakyReLU is
    # monotone, so it is applied to the two resulting scalars in the wrapper
    # (saves a mul + cmp + select per element over the full N^2 slab).
    first = (pl.program_id(0) == 0) & (pl.program_id(1) == 0)

    @pl.when(first)
    def _():
        min_ref[...] = jnp.full(min_ref.shape, jnp.inf, min_ref.dtype)
        max_ref[...] = jnp.full(max_ref.shape, -jnp.inf, max_ref.dtype)

    raw = s1_ref[...] + s0t_ref[...]                      # (TM, TK) f32
    edge = adj_ref[...] > 0                               # int8 mask -> bool

    row_max = jnp.max(jnp.where(edge, raw, -jnp.inf), axis=1, keepdims=True)
    row_min = jnp.min(jnp.where(edge, raw, jnp.inf), axis=1, keepdims=True)
    t_max = jnp.max(row_max, axis=0, keepdims=True)       # (1, 1)
    t_min = jnp.min(row_min, axis=0, keepdims=True)       # (1, 1)

    min_ref[...] = jnp.minimum(min_ref[...], t_min)
    max_ref[...] = jnp.maximum(max_ref[...], t_max)


def _agg_kernel(alpha, ones_col, s1_ref, s0t_ref, inv_ref, shift_ref, adj_ref,
                xp_ref, out_ref, acc_ref):
    k = pl.program_id(1)

    @pl.when(k == 0)
    def _():
        acc_ref[...] = jnp.zeros_like(acc_ref)

    # Fold the global 1/(max-min) scale into the per-node scores (O(TM+TK) work per
    # tile) instead of one extra f32 multiply per att element.  Exact: LeakyReLU is
    # positively homogeneous and inv_range > 0.
    inv_range = inv_ref[...]                               # (1, 1)
    s1s = s1_ref[...] * inv_range                          # (TM, 1)
    s0s = s0t_ref[...] * inv_range                         # (1, TK)

    att = s1s + s0s                                        # (TM, TK) f32
    att = jnp.maximum(att, alpha * att)                    # LeakyReLU (0 <= alpha < 1)
    att = jnp.exp(att - shift_ref[...])                    # normalized -> exp (EUP)
    att = jnp.where(adj_ref[...] > 0, att, 0.0)            # zero the non-edges

    # TODO(synk): nn.Dropout on att is identity in eval mode; training-mode dropout
    # would need pltpu.prng_seed / pltpu.stateful_bernoulli with a supplied seed.

    acc_ref[...] += jnp.dot(att.astype(jnp.bfloat16), xp_ref[...],
                            preferred_element_type=jnp.float32)

    @pl.when(k == pl.num_programs(1) - 1)
    def _():
        h = acc_ref[...]                                   # (TM, F_PAD) f32
        rows_sum = h[:, ones_col:ones_col + 1]             # SpMM(att, ones): free MXU col
        inv_rows = pl.reciprocal(rows_sum, approx=True)    # EUP, frees VPU divides
        out_ref[...] = (h * inv_rows).astype(out_ref.dtype)


# ----------------------------- wrapper ------------------------------------ #

def _vmem_capacity_bytes():
    try:
        info = pltpu.get_tpu_info()
        cap = getattr(info, "vmem_capacity_bytes", None)
        if cap:
            return int(cap)
    except Exception:
        pass
    return 64 * 1024 * 1024            # conservative default (v7x per-core)


def _pass_c_vmem(tm, tk, f_pad):
    return (2 * tm * tk                # adj int8 tile, double-buffered
            + 2 * tk * f_pad * 2       # xp bf16 tile, double-buffered
            + 2 * tm * f_pad * 4       # out tile, double-buffered
            + tm * f_pad * 4           # f32 accumulator scratch
            + 4 * tm * tk * 4          # elementwise f32 temporaries
            + 4 * (tm + tk) * 4        # s1 / s0t slivers
            + 8 * 1024 * 1024)         # Mosaic internal headroom


def _tile_candidates(n, cands):
    out = [c for c in cands if c <= n and n % c == 0]
    return out or [n]


def _choose_tiles(n, f_pad, budget):
    # Shrink the tiles (never the VMEM limit) until the pass-C working set fits.
    tm_cands = _tile_candidates(n, (512, 256, 128, 64, 32, 16, 8))
    tk_cands = _tile_candidates(n, (2048, 1024, 512, 256, 128))
    for tm in tm_cands:
        for tk in tk_cands:
            if _pass_c_vmem(tm, tk, f_pad) <= budget:
                return tm, tk
    return tm_cands[-1], tk_cands[-1]   # tiny / awkward graphs: smallest legal pair


def gat_conv_forward(X, W, a0, a1, adj, *, alpha=0.2, tm=None, tk=None):
    X = X.astype(jnp.float32)
    W = W.astype(jnp.float32)
    a0 = a0.astype(jnp.float32)
    a1 = a1.astype(jnp.float32)

    N, f_in = X.shape
    f_out = W.shape[1]
    # Lane-dense output columns plus at least one spare padding column for the
    # MXU ones-column rows_sum trick.
    f_pad = ((f_out + 1 + 127) // 128) * 128
    ones_col = f_pad - 1
    alpha = float(alpha)               # baked literal, NOT a captured jax constant
    assert 0.0 <= alpha < 1.0          # maximum-based LeakyReLU + monotone min/max fold

    # Generation-aware VMEM budget: ~48 MiB on v7x (64 physical), ~96 MiB on v5e/v6e.
    budget = min((_vmem_capacity_bytes() * 3) // 4, 112 * 1024 * 1024)
    tm_auto, tk_auto = _choose_tiles(N, f_pad, budget)
    if tm is None or N % tm != 0:
        tm = tm_auto
    if tk is None or N % tk != 0:
        tk = tk_auto
    n_i, n_k = N // tm, N // tk

    # Zero-pad the feature dim: free on the MXU, turns masked vst.msk output stores
    # into unmasked lane-dense stores.
    W_p = jnp.pad(W, ((0, 0), (0, f_pad - f_out)))

    # Per-node scores folded through W (tiny XLA matmuls on the raw inputs; they do
    # NOT sit on the pass-A -> pass-B critical path): scores[:,0]=Xp·a0, [:,1]=Xp·a1.
    Wa = W @ jnp.concatenate([a0, a1], axis=0).T           # (f_in, 2)
    scores = X @ Wa                                        # (N, 2)
    s0t = scores[:, 0].reshape(1, N)                       # source term, lane layout
    s1 = scores[:, 1].reshape(N, 1)                        # destination term

    # Adjacency streamed as an int8 {0,1} mask (4x less HBM / VMEM than f32).
    # TODO(synk): a weighted (non-binary) adjacency (reference: exp(att) * adj) would
    # need the raw values streamed instead of a mask.
    adj_i8 = (adj > 0).astype(jnp.int8)

    # ---- pass A: X_prime = X @ W (bf16, padded, spare ones column) ----
    xp_bf16 = pl.pallas_call(
        functools.partial(_project_kernel, ones_col),
        grid=(n_i,),
        in_specs=[
            pl.BlockSpec((tm, f_in), lambda i: (i, 0)),
            pl.BlockSpec((f_in, f_pad), lambda i: (0, 0)),
        ],
        out_specs=pl.BlockSpec((tm, f_pad), lambda i: (i, 0)),
        out_shape=jax.ShapeDtypeStruct((N, f_pad), jnp.bfloat16),
        compiler_params=pltpu.CompilerParams(
            dimension_semantics=("parallel",),
            vmem_limit_bytes=budget,
        ),
    )(X, W_p)

    # ---- pass B: global min / max of raw edge scores ----
    raw_min, raw_max = pl.pallas_call(
        _minmax_kernel,
        grid=(n_i, n_k),
        in_specs=[
            pl.BlockSpec((tm, 1), lambda i, k: (i, 0)),
            pl.BlockSpec((1, tk), lambda i, k: (0, k)),
            pl.BlockSpec((tm, tk), lambda i, k: (i, k)),
        ],
        out_specs=[
            pl.BlockSpec((1, 1), lambda i, k: (0, 0)),
            pl.BlockSpec((1, 1), lambda i, k: (0, 0)),
        ],
        out_shape=[
            jax.ShapeDtypeStruct((1, 1), jnp.float32),
            jax.ShapeDtypeStruct((1, 1), jnp.float32),
        ],
        compiler_params=pltpu.CompilerParams(
            dimension_semantics=("arbitrary", "arbitrary"),
            vmem_limit_bytes=budget,
        ),
        cost_estimate=pl.CostEstimate(
            flops=4 * N * N, transcendentals=0, bytes_accessed=N * N + 8 * N),
    )(s1, s0t, adj_i8)

    # LeakyReLU is monotone -> apply it to the two scalars only, then fold the scale.
    lrelu = lambda v: jnp.where(v > 0, v, alpha * v)
    att_min = lrelu(raw_min)
    att_max = lrelu(raw_max)
    # eps guard only changes the degenerate all-edges-equal case (NaN in the reference).
    inv_range = 1.0 / jnp.maximum(att_max - att_min, 1e-12)   # (1, 1)
    shift = att_min * inv_range                               # (1, 1)

    # ---- pass C: normalize, exp, masked SpMM, row-normalize ----
    h_pad = pl.pallas_call(
        functools.partial(_agg_kernel, alpha, ones_col),
        grid=(n_i, n_k),
        in_specs=[
            pl.BlockSpec((tm, 1), lambda i, k: (i, 0)),
            pl.BlockSpec((1, tk), lambda i, k: (0, k)),
            pl.BlockSpec((1, 1), lambda i, k: (0, 0)),
            pl.BlockSpec((1, 1), lambda i, k: (0, 0)),
            pl.BlockSpec((tm, tk), lambda i, k: (i, k)),
            pl.BlockSpec((tk, f_pad), lambda i, k: (k, 0)),
        ],
        out_specs=pl.BlockSpec((tm, f_pad), lambda i, k: (i, 0)),
        out_shape=jax.ShapeDtypeStruct((N, f_pad), jnp.float32),
        scratch_shapes=[pltpu.VMEM((tm, f_pad), jnp.float32)],
        compiler_params=pltpu.CompilerParams(
            dimension_semantics=("parallel", "arbitrary"),
            vmem_limit_bytes=budget,
        ),
        cost_estimate=pl.CostEstimate(
            flops=2 * N * N * f_pad + 6 * N * N,
            transcendentals=N * N,
            bytes_accessed=N * N + N * f_pad * 6 + 8 * N),
    )(s1, s0t, inv_range, shift, adj_i8, xp_bf16)

    return h_pad[:, :f_out]


# ----------------------------- reference / test ---------------------------- #

def _reference(X, W, a0, a1, adj, alpha=0.2):
    Xp = X @ W
    att = (Xp @ a1.T) + (Xp @ a0.T).T
    att = jnp.where(att > 0, att, alpha * att)
    is_edge = adj > 0
    att_max = jnp.max(jnp.where(is_edge, att, -jnp.inf))
    att_min = jnp.min(jnp.where(is_edge, att, jnp.inf))
    att = (att - att_min) / (att_max - att_min)
    att = jnp.exp(att) * adj
    rows_sum = jnp.sum(att, axis=-1, keepdims=True)
    return (att @ Xp) / rows_sum


if __name__ == "__main__":
    key = jax.random.PRNGKey(0)
    k_x, k_w, k_a0, k_a1, k_adj = jax.random.split(key, 5)

    N = 256           # num_nodes -> 2x2 grid of (128,128) tiles exercises both axes
    input_dim = 64
    output_dim = 32
    alpha = 0.2       # LeakyReLU negative slope
    gain = math.sqrt(2.0)  # nn.init.calculate_gain('relu')

    # Deterministic xavier_normal-style init (std = gain * sqrt(2 / (fan_in + fan_out)))
    w_std = gain * math.sqrt(2.0 / (input_dim + output_dim))
    a_std = gain * math.sqrt(2.0 / (1 + output_dim))
    W = (w_std * jax.random.normal(k_w, (input_dim, output_dim))).astype(jnp.float32)
    a0 = (a_std * jax.random.normal(k_a0, (1, output_dim))).astype(jnp.float32)
    a1 = (a_std * jax.random.normal(k_a1, (1, output_dim))).astype(jnp.float32)

    X = jax.random.normal(k_x, (N, input_dim), dtype=jnp.float32)

    # Synthetic sparse graph as a dense {0,1} mask; self-loops so every row has edges.
    adj = jax.random.bernoulli(k_adj, 0.1, (N, N)).astype(jnp.float32)
    adj = jnp.maximum(adj, jnp.eye(N, dtype=jnp.float32))

    out = gat_conv_forward(X, W, a0, a1, adj, alpha=alpha, tm=128, tk=128)
    out = jax.block_until_ready(out)

    ref = _reference(X, W, a0, a1, adj, alpha)
    assert out.shape == (N, output_dim)
    max_err = float(jnp.max(jnp.abs(out - ref)))
    # bf16 MXU operands (consistent numerator/denominator) + approx reciprocal
    # => relaxed tolerance vs the pure-f32 reference (tf32 spirit of the CUDA code).
    assert jnp.allclose(out, ref, rtol=2e-2, atol=2e-2), f"mismatch vs reference: {max_err}"

    print("KERNEL_OK")
</pallas_src>

<mosaic_0001>
module attributes {stable_mosaic.version = 11 : i64} {
  func.func @_project_kernel(%arg0: i32, %arg1: memref<128x64xf32, #tpu.memory_space<vmem>>, %arg2: memref<64x128xf32, #tpu.memory_space<vmem>>, %arg3: memref<128x128xbf16, #tpu.memory_space<vmem>>) attributes {dimension_semantics = [#tpu.dimension_semantics<parallel>], iteration_bounds = array<i64: 2>, scalar_prefetch = 0 : i64, scratch_operands = 0 : i64, tpu.core_type = #tpu.core_type<tc>, window_params = [{transform_indices = @transform_0, window_bounds = array<i64: 128, 64>}, {pipeline_mode = #tpu.pipeline_mode<synchronous>, transform_indices = @transform_1, window_bounds = array<i64: 64, 128>}, {transform_indices = @transform_2, window_bounds = array<i64: 128, 128>}]} {
    %c0 = arith.constant 0 : index
    %c0_0 = arith.constant 0 : index
    %0 = vector.load %arg1[%c0, %c0_0] : memref<128x64xf32, #tpu.memory_space<vmem>>, vector<128x64xf32>
    %c0_1 = arith.constant 0 : index
    %c0_2 = arith.constant 0 : index
    %1 = vector.load %arg2[%c0_1, %c0_2] : memref<64x128xf32, #tpu.memory_space<vmem>>, vector<64x128xf32>
    %cst = arith.constant dense<0.000000e+00> : vector<128x128xf32>
    %2 = tpu.matmul %0, %1, %cst {dimension_numbers = #tpu.dot_dimension_numbers<[1], [0], [0], [1], [0, 0, 1, 1], [], []>} : vector<128x64xf32>, vector<64x128xf32>, vector<128x128xf32> -> vector<128x128xf32>
    %3 = tpu.iota {dimensions = array<i32: 1>} : vector<128x128xi32>
    %c127_i32 = arith.constant 127 : i32
    %4 = vector.broadcast %c127_i32 : i32 to vector<128x128xi32>
    %5 = arith.cmpi eq, %3, %4 : vector<128x128xi32>
    %cst_3 = arith.constant 1.000000e+00 : f32
    %6 = vector.broadcast %cst_3 : f32 to vector<128x128xf32>
    %7 = arith.select %5, %6, %2 : vector<128x128xi1>, vector<128x128xf32>
    %8 = arith.truncf %7 : vector<128x128xf32> to vector<128x128xbf16>
    %c0_4 = arith.constant 0 : index
    %c0_5 = arith.constant 0 : index
    %9 = vector.load %arg3[%c0_4, %c0_5] : memref<128x128xbf16, #tpu.memory_space<vmem>>, vector<128x128xbf16>
    tpu.vector_store %arg3[%c0_4, %c0_5], %8 {strides = array<i32>} : memref<128x128xbf16, #tpu.memory_space<vmem>>, vector<128x128xbf16>,
    return
  }
  func.func @transform_0(%arg0: i32) -> (i32, i32) {
    %c0_i32 = arith.constant 0 : i32
    %c0_i32_0 = arith.constant 0 : i32
    return %arg0, %c0_i32 : i32, i32
  }
  func.func @transform_1(%arg0: i32) -> (i32, i32) {
    %c0_i32 = arith.constant 0 : i32
    %c0_i32_0 = arith.constant 0 : i32
    %c0_i32_1 = arith.constant 0 : i32
    return %c0_i32, %c0_i32_0 : i32, i32
  }
  func.func @transform_2(%arg0: i32) -> (i32, i32) {
    %c0_i32 = arith.constant 0 : i32
    %c0_i32_0 = arith.constant 0 : i32
    return %arg0, %c0_i32 : i32, i32
  }
}

</mosaic_0001>

<bundles_post_ra>
// kernel: tpu_custom_call.1
= control target key start
LH: loop header
LB: loop body
LE: loop exit
PB: predicated region body
PF: predicated region fallthrough
CT: control target
= control target key end

     0   :  { %7 = vsyncpa [#allocation3], 0  ;;  %s807_s0 = inlined_call_operand.vmem [shape: f32[256,64], index: 0, kind: input, shape index: {}]   ;;  %s808_s1 = inlined_call_operand.vmem [shape: f32[64,128], index: 1, kind: input, shape index: {}]   ;;  %s809_s2 = inlined_call_operand.hbm [shape: bf16[256,128], index: 2, kind: output, shape index: {}]  }
   0x1   :  { %9 = vsyncpa [#allocation3 + $0x1], 0  ;;  %s634_s9 = smov 0   ;;  %s636_s10 = smov 0  }
   0x2   :  { %s638_s11 = smov 0   ;;  %s640_s12 = smov 0  }
   0x3 LB: > { %s655_s13 = sadd.s32 4294967295, %s615_s12   ;;  %s412_s14 = sadd.s32 4294967294, %s615_s12   ;;  %s615_s12 = sphi %s640_s12, %s815_s12   ;;  %s611_s11 = sphi %s638_s11, %s814_s11   ;;  %s607_s10 = sphi %s636_s10, %s813_s10   ;;  %s603_s9 = sphi %s634_s9, %s812_s9  }
   0x4   : > { %s659_s15 = sadd.s32 1, %s615_s12   ;;  %s69_s16 = sadd.s32 1, %s611_s11 }
   0x5   : > { %s66_s17 = ssub.s32 %s615_s12, %s659_s15  ;;  %p79_p0 = scmp.ne.s32.totalorder %s611_s11, %s607_s10 }
   0x6   : > { %p67_p1 = scmp.eq.s32.totalorder %s66_s17, 0  ;;  %p80_p2 = scmp.eq.s32.totalorder %s655_s13, 1 }
   0x7   : > { %p85_p3 = scmp.ne.s32.totalorder %s607_s10, %s603_s9  ;;  %p86_p4 = scmp.eq.s32.totalorder %s412_s14, 1 }
   0x8   : > { %s670_s18 = scalar_select %p67_p1, %s611_s11, %s69_s16  }
   0x9   : > { %p672_p5 = por %p80_p2, %p79_p0  ;;  %p676_p6 = por %p86_p4, %p85_p3 }
   0xa   : > { %p415_p7 = scmp.ge.s32.totalorder %s615_s12, 1  ;;  %p116_p8 = scmp.lt.s32.totalorder %s615_s12, 3 }
   0xc   : > { %p117_p9 = pnand %p415_p7, %p116_p8 }
   0xd   : > { %s417_s25 = sshll.u32 (!%p117_p9), %s655_s13, 4  ;;  %s135_s23 = sand.u32 (!%p117_p9), 1, %s607_s10  }
   0xe   : > { %120 = sbr.rel (%p117_p9) target bundleno = 201 (0xc9), region = 28  ;;  %p139_p10 = scmp.lt.s32.totalorder (!%p117_p9), %s417_s25, 31 }
   0xf   : > { %s416_s24 = sshll.u32 (!%p117_p9), %s135_s23, 6  ;;  %s440_s26 = sshll.u32 (!%p117_p9), %s655_s13, 6 }
  0x10   : > { %s346_s29 = scalar_lea.hbm (!%p117_p9), %s809_s2, %s440_s26  ;;  %s335_s3 = scalar_lea.sflag (!%p117_p9), [#allocation3], %s135_s23 }
  0x11   : > { %s349_s30 = sshll.u32 (!%p117_p9), %s346_s29, 4  ;;  %s573_s8 = scalar_lea.hbm (!%p117_p9), %s809_s2, 128  ;;  %s350_s30 = int_to_ptr.hbm [resolvable:$true] %s349_s30 }
  0x12   : > { %s567_s4 = sshra.s32 (!%p117_p9), %s350_s30, 4  ;;  %s568_s4 = int_to_ptr.hbm [resolvable:$true] %s567_s4 }
  0x13   : > { %v168_v0 = vld [vmem:[%s808_s1 + $0x38] sm:$0xff]  ;;  %v167_v1 = vld [vmem:[%s808_s1 + $0x30] sm:$0xff]  ;;  %v166_v2 = vld [vmem:[%s808_s1 + $0x28] sm:$0xff]  ;;  %s817_s25 = smov (!%p139_p10, %s417_s25), 31  ;;  %vm169_vm0 = vcmask 523264   ;;  %v283_v24 = vlaneseq  ;;  %s569_s5 = scalar_lea.hbm %s568_s4, 64 }
  0x14   : > { %226 = vmatpush.msra.mxu0 %v168_v0  ;;  %488 = vmatpush.msra.mxu1 %v168_v0  ;;  %v165_v3 = vld [vmem:[%s808_s1 + $0x20] sm:$0xff]  ;;  %v164_v4 = vld [vmem:[%s808_s1 + $0x18] sm:$0xff]  ;;  %v163_v5 = vld [vmem:[%s808_s1 + $0x10] sm:$0xff]  ;;  %s418_s6 = sshll.u32 %s817_s25, 3  ;;  %s751_s25 = scalar_lea.vmem [#allocation2], %s416_s24 }
  0x15   : > { %489 = vmatpush.msra.mxu2 %v168_v0  ;;  %490 = vmatpush.msra.mxu3 %v168_v0  ;;  %v162_v6 = vld [vmem:[%s808_s1 + $0x8] sm:$0xff]  ;;  %s707_s17 = scalar_lea.vmem %s807_s0, %s418_s6  ;;  %v161_v7 = vld [vmem:[%s808_s1] sm:$0xff]  ;;  %v284_v27 = vand.u32 127, %v283_v24  ;;  %s347_s13 = sshll.u32 %s751_s25, 4  ;;  %s348_s13 = int_to_ptr.vmem [resolvable:$true] %s347_s13 }
  0x16   : > { %227 = vmatpush.msra.mxu0 %v167_v1  ;;  %491 = vmatpush.msra.mxu1 %v167_v1  ;;  %v145_v8 = vld [vmem:[%s707_s17] sm:$0xff]  ;;  %v146_v12 = vld [vmem:[%s707_s17 + $0x8] sm:$0xff]  ;;  %v147_v16 = vld [vmem:[%s707_s17 + $0x10] sm:$0xff]  ;;  %p570_p11 = scmp.ne.s32.totalorder %s568_s4, %s569_s5  ;;  %p574_p0 = scmp.lt.s32.totalorder %s568_s4, %s809_s2 }
  0x17   : > { %492 = vmatpush.msra.mxu2 %v167_v1  ;;  %493 = vmatpush.msra.mxu3 %v167_v1  ;;  %v149_v9 = vld [vmem:[%s707_s17 + $0x20] sm:$0xff]  ;;  %v150_v13 = vld [vmem:[%s707_s17 + $0x28] sm:$0xff]  ;;  %v151_v17 = vld [vmem:[%s707_s17 + $0x30] sm:$0xff]  ;;  %vm285_vm1 = vcmp.eq.s32.totalorder %v284_v27, 127  ;;  %p575_p1 = scmp.lt.s32.totalorder %s573_s8, %s569_s5 }
  0x18   : > { %228 = vmatpush.msra.mxu0 %v166_v2  ;;  %494 = vmatpush.msra.mxu1 %v166_v2  ;;  %v153_v10 = vld [vmem:[%s707_s17 + $0x40] sm:$0xff]  ;;  %v154_v14 = vld [vmem:[%s707_s17 + $0x48] sm:$0xff]  ;;  %v155_v18 = vld [vmem:[%s707_s17 + $0x50] sm:$0xff]  ;;  %p571_p12 = pnand %p570_p11, %p672_p5 }
  0x19   : > { %495 = vmatpush.msra.mxu2 %v166_v2  ;;  %496 = vmatpush.msra.mxu3 %v166_v2  ;;  %v157_v11 = vld [vmem:[%s707_s17 + $0x60] sm:$0xff]  ;;  %v158_v15 = vld [vmem:[%s707_s17 + $0x68] sm:$0xff]  ;;  %v159_v19 = vld [vmem:[%s707_s17 + $0x70] sm:$0xff]  ;;  %p576_p2 = por %p575_p1, %p574_p0 }
  0x1a   : > { %229 = vmatpush.msra.mxu0 %v165_v3  ;;  %497 = vmatpush.msra.mxu1 %v165_v3  ;;  %v148_v20 = vld [vmem:[%s707_s17 + $0x18] sm:$0xff]  ;;  %p572_p13 = pneg %p571_p12 }
  0x1b   : > { %498 = vmatpush.msra.mxu2 %v165_v3  ;;  %499 = vmatpush.msra.mxu3 %v165_v3  ;;  %v152_v21 = vld [vmem:[%s707_s17 + $0x38] sm:$0xff] }
  0x1c   : > { %230 = vmatpush.msra.mxu0 %v164_v4  ;;  %500 = vmatpush.msra.mxu1 %v164_v4  ;;  %v156_v22 = vld [vmem:[%s707_s17 + $0x58] sm:$0xff]  ;;  %p577_p3 = pnand %p576_p2, %p572_p13 }
  0x1d   : > { %501 = vmatpush.msra.mxu2 %v164_v4  ;;  %502 = vmatpush.msra.mxu3 %v164_v4  ;;  %v160_v23 = vld [vmem:[%s707_s17 + $0x78] sm:$0xff] }
  0x1e   : > { %231 = vmatpush.msra.mxu0 %v163_v5  ;;  %503 = vmatpush.msra.mxu1 %v163_v5 }
  0x1f   : > { %504 = vmatpush.msra.mxu2 %v163_v5  ;;  %505 = vmatpush.msra.mxu3 %v163_v5 }
  0x20   : > { %232 = vmatpush.msra.mxu0 %v162_v6  ;;  %506 = vmatpush.msra.mxu1 %v162_v6 }
  0x21   : > { %507 = vmatpush.msra.mxu2 %v162_v6  ;;  %508 = vmatpush.msra.mxu3 %v162_v6 }
  0x22   : > { %233 = vmatpush.msra.mxu0 %v161_v7  ;;  %509 = vmatpush.msra.mxu1 %v161_v7 }
  0x23   : > { %510 = vmatpush.msra.mxu2 %v161_v7  ;;  %511 = vmatpush.msra.mxu3 %v161_v7 }
  0x24   : > { %419 = vmatmul.msk.f32.vlgmr.msra.gmra.mxu0 %vm169_vm0, %v145_v8  ;;  %423 = vmatmul.msk.f32.vlgmr.msra.gmra.mxu1 %vm169_vm0, %v149_v9 }
  0x25   : > { %427 = vmatmul.msk.f32.vlgmr.msra.gmra.mxu2 %vm169_vm0, %v153_v10  ;;  %431 = vmatmul.msk.f32.vlgmr.msra.gmra.mxu3 %vm169_vm0, %v157_v11 }
  0x2c   : > { %420 = vmatmul.msk.f32.gmra.mxu0 %vm169_vm0, %v146_v12  ;;  %424 = vmatmul.msk.f32.gmra.mxu1 %vm169_vm0, %v150_v13 }
  0x2d   : > { %428 = vmatmul.msk.f32.gmra.mxu2 %vm169_vm0, %v154_v14  ;;  %432 = vmatmul.msk.f32.gmra.mxu3 %vm169_vm0, %v158_v15 }
  0x34   : > { %421 = vmatmul.msk.f32.gmra.mxu0 %vm169_vm0, %v147_v16  ;;  %425 = vmatmul.msk.f32.gmra.mxu1 %vm169_vm0, %v151_v17 }
  0x35   : > { %429 = vmatmul.msk.f32.gmra.mxu2 %vm169_vm0, %v155_v18  ;;  %433 = vmatmul.msk.f32.gmra.mxu3 %vm169_vm0, %v159_v19 }
  0x3c   : > { %422 = vmatmul.msk.f32.gmra.mxu0 %vm169_vm0, %v148_v20  ;;  %426 = vmatmul.msk.f32.gmra.mxu1 %vm169_vm0, %v152_v21 }
  0x3d   : > { %430 = vmatmul.msk.f32.gmra.mxu2 %vm169_vm0, %v156_v22  ;;  %434 = vmatmul.msk.f32.gmra.mxu3 %vm169_vm0, %v160_v23 }
  0xa1   : > { %v235_v25 = vpop.f32.mrf.mxu0  ;;  %v247_v26 = vpop.f32.mrf.mxu1 }
  0xa2   : > { %v286_v32 = vsel %vm285_vm1, 1.0, %v235_v25  ;;  %v290_v33 = vsel %vm285_vm1, 1.0, %v247_v26 }
  0xa8   : > { %v259_v28 = vpop.f32.mrf.mxu2  ;;  %v271_v29 = vpop.f32.mrf.mxu3 }
  0xa9   : > { %v238_v30 = vpop.f32.mrf.mxu0  ;;  %v250_v31 = vpop.f32.mrf.mxu1  ;;  %v294_v40 = vsel %vm285_vm1, 1.0, %v259_v28  ;;  %v298_v41 = vsel %vm285_vm1, 1.0, %v271_v29 }
  0xaa   : > { %v287_v34 = vsel %vm285_vm1, 1.0, %v238_v30  ;;  %v291_v35 = vsel %vm285_vm1, 1.0, %v250_v31 }
  0xab   : > { %v444_v36 = vpack.c.bf16 %v287_v34, %v286_v32  ;;  %v454_v37 = vpack.c.bf16 %v291_v35, %v290_v33 }
  0xad   : > { %445 = vst [vmem:[%s751_s25] sm:$0xff] %v444_v36  }
  0xae   : > { %482 = vst [vmem:[%s751_s25 + $0x10] sm:$0xff] %v454_v37  }
  0xb0   : > { %v262_v38 = vpop.f32.mrf.mxu2  ;;  %v274_v39 = vpop.f32.mrf.mxu3 }
  0xb1   : > { %v295_v42 = vsel %vm285_vm1, 1.0, %v262_v38  ;;  %v299_v43 = vsel %vm285_vm1, 1.0, %v274_v39  ;;  %v241_v44 = vpop.f32.mrf.mxu0  ;;  %v253_v45 = vpop.f32.mrf.mxu1 }
  0xb2   : > { %v464_v46 = vpack.c.bf16 %v295_v42, %v294_v40  ;;  %v474_v47 = vpack.c.bf16 %v299_v43, %v298_v41  ;;  %v288_v52 = vsel %vm285_vm1, 1.0, %v241_v44  ;;  %v292_v53 = vsel %vm285_vm1, 1.0, %v253_v45 }
  0xb4   : > { %484 = vst [vmem:[%s751_s25 + $0x20] sm:$0xff] %v464_v46  }
  0xb5   : > { %486 = vst [vmem:[%s751_s25 + $0x30] sm:$0xff] %v474_v47  }
  0xb8   : > { %v265_v48 = vpop.f32.mrf.mxu2  ;;  %v277_v49 = vpop.f32.mrf.mxu3 }
  0xb9   : > { %v244_v50 = vpop.f32.mrf.mxu0  ;;  %v256_v51 = vpop.f32.mrf.mxu1  ;;  %v296_v60 = vsel %vm285_vm1, 1.0, %v265_v48  ;;  %v300_v61 = vsel %vm285_vm1, 1.0, %v277_v49 }
  0xba   : > { %v289_v54 = vsel %vm285_vm1, 1.0, %v244_v50  ;;  %v293_v55 = vsel %vm285_vm1, 1.0, %v256_v51 }
  0xbb   : > { %v449_v56 = vpack.c.bf16 %v289_v54, %v288_v52  ;;  %v459_v57 = vpack.c.bf16 %v293_v55, %v292_v53 }
  0xbd   : > { %481 = vst [vmem:[%s751_s25 + $0x8] sm:$0xff] %v449_v56  }
  0xbe   : > { %483 = vst [vmem:[%s751_s25 + $0x18] sm:$0xff] %v459_v57  }
  0xc0   : > { %v268_v58 = vpop.f32.mrf.mxu2  ;;  %v280_v59 = vpop.f32.mrf.mxu3 }
  0xc1   : > { %v297_v62 = vsel %vm285_vm1, 1.0, %v268_v58  ;;  %v301_v63 = vsel %vm285_vm1, 1.0, %v280_v59 }
  0xc2   : > { %v469_v0 = vpack.c.bf16 %v297_v62, %v296_v60  ;;  %v479_v1 = vpack.c.bf16 %v301_v63, %v300_v61 }
  0xc4   : > { %485 = vst [vmem:[%s751_s25 + $0x28] sm:$0xff] %v469_v0  }
  0xc5   : > { %487 = vst [vmem:[%s751_s25 + $0x38] sm:$0xff] %v479_v1  }
  0xc6   : > { %580 = shalt.err (!%p577_p3)
}
  0xc7   : > { %s617_s17 = smov 64   ;;  %s618_s21 = smov 4  }
  0xc8   : > { %512 = dma.vmem_to_hbm [thread:$0]  (%p672_p5), %s348_s13, 1024, %s350_s30, %s335_s3, %s617_s17, %s617_s17, %s618_s21  }
  0xc9 PF: > { %p518_p4 = scmp.ge.s32.totalorder %s615_s12, 2  ;;  %s364_s22 = sand.u32 1, %s603_s9  }
  0xca   : > { %s365_s23 = scalar_lea.sflag [#allocation3], %s364_s22 }
  0xcb   : > { %p515_p7 = pnand %p518_p4, %p676_p6 }
  0xcd   : > { %p516_p8 = pneg %p515_p7 }
  0xcf   : > { %598 = dma.done.wait (%p516_p8), %s365_s23, 1024  }
  0xd0   : > { %600 = vsyncadd (%p516_p8), %s365_s23, 4294966272  ;;  %p12_p9 = scmp.ge.s32.totalorder %s659_s15, 4   ;;  %s812_s9 = smov %s607_s10 }
  0xd1   : > { %s813_s10 = smov %s611_s11  ;;  %s814_s11 = smov %s670_s18 }
  0xd2   : > { %s815_s12 = smov %s659_s15  ;;  %14 = sbr.rel (!%p12_p9) target bundleno = 3 (0x3), region = 63 }
  0xd7   :  { %371 = vsyncpa [#allocation3], 1 }
  0xd8   :  { %373 = vsyncpa [#allocation3 + $0x1], 1 }

</bundles_post_ra>
